<compile_context>
chip_gen: v6e
topology: v6e:2x2x1
jax: 0.10.0
libtpu: 0.0.40
codegen_flags: <defaults>
</compile_context>

<pallas_src>
import jax
import jax.numpy as jnp
from jax.experimental import pallas as pl
from jax.experimental.pallas import tpu as pltpu


# --------------------------------------------------------------------------
# Fused kernel: encoder -> in-kernel "same" pad -> conv taps -> ReLU
#               -> global max over sequence -> fc head
# Grid: (B // TB,) over batch, "parallel".
# --------------------------------------------------------------------------
def fused_kernel(emb_ref, mask_ref, w_enc_ref, b_enc_ref,
                 w_conv_ref, b_conv_ref, w_fc_ref, b_fc_ref,
                 o_ref, hpad_ref):
    TB, S, Hin = emb_ref.shape
    H = w_enc_ref.shape[1]
    K, _, C = w_conv_ref.shape
    pad = (K - 1) // 2

    # ---- BERT-style encoder: one flattened [TB*S, Hin] x [Hin, H] MXU matmul
    x = emb_ref[...].reshape(TB * S, Hin).astype(jnp.float32)
    h = jnp.dot(x, w_enc_ref[...].astype(jnp.float32),
                preferred_element_type=jnp.float32)
    h = jnp.tanh(h + b_enc_ref[...].astype(jnp.float32))            # EUP
    h = h * mask_ref[...].reshape(TB * S, 1).astype(jnp.float32)    # VPU

    # ---- In-kernel "same" padding into VMEM scratch.
    # Scratch persists across grid steps, so the halo rows must be re-zeroed
    # every step (megacore-safe: each core re-zeros its own scratch) to avoid
    # stale data leaking into the boundary taps.
    if pad > 0:
        zeros_halo = jnp.zeros((TB, pad, H), jnp.float32)
        hpad_ref[:, :pad, :] = zeros_halo
        hpad_ref[:, pad + S:, :] = zeros_halo
    hpad_ref[:, pad:pad + S, :] = h.reshape(TB, S, H)

    # ---- Conv1d as K shifted 2-D matmuls [TB*S, H] x [H, C], f32 accumulate.
    # Center tap (k == pad) is fed directly from `h` (still live in vregs),
    # skipping one [TB*S, H] scratch reload; shifted taps read the padded
    # scratch.  (Requires odd K, asserted in the wrapper.)
    acc = jnp.dot(h, w_conv_ref[pad].astype(jnp.float32),
                  preferred_element_type=jnp.float32)
    for k in range(K):                                   # static unrolled taps
        if k == pad:
            continue
        tap = hpad_ref[:, k:k + S, :].reshape(TB * S, H)
        acc = acc + jnp.dot(tap, w_conv_ref[k].astype(jnp.float32),
                            preferred_element_type=jnp.float32)
    y = jnp.maximum(acc + b_conv_ref[...].astype(jnp.float32), 0.0)  # ReLU

    # ---- AdaptiveMaxPool1d(1).squeeze(-1): global max over sequence.
    pooled = jnp.max(y.reshape(TB, S, C), axis=1)                    # [TB, C]

    # ---- fc head (output lanes pre-padded to a multiple of 128 on the host).
    logits = jnp.dot(pooled, w_fc_ref[...].astype(jnp.float32),
                     preferred_element_type=jnp.float32)
    logits = logits + b_fc_ref[...].astype(jnp.float32)
    o_ref[...] = logits.reshape(TB, 1, -1).astype(o_ref.dtype)


# --------------------------------------------------------------------------
# Wrapper
# --------------------------------------------------------------------------
def combined_model_forward(input_ids, attention_mask, params, *, tb=1):
    B, S = input_ids.shape
    Hin = params["tok_emb"].shape[1]
    H = params["w_enc"].shape[1]
    K, _, C = params["w_conv"].shape
    N = params["w_fc"].shape[1]
    pad = (K - 1) // 2
    assert B % tb == 0, "batch tile must divide batch"
    assert K % 2 == 1, "conv kernel assumed odd (same-padding feature extractor)"

    LANES = 128
    n_pad = pl.cdiv(N, LANES) * LANES      # lane-dense logits output

    # Host glue: embedding gather + position embeddings (fused by XLA).
    # TODO(synk): move the gather into the kernel via PrefetchScalarGridSpec
    # scalar-prefetched input_ids + pl.Element row-gather on tok_emb.
    emb = jnp.take(params["tok_emb"], input_ids, axis=0) + params["pos_emb"][None, :, :]
    mask = attention_mask.astype(jnp.float32)[:, :, None]            # [B, S, 1]

    # One-time host re-layout: pad fc weights to a lane-dense width.
    w_fc_pad = jnp.zeros((C, n_pad), jnp.float32).at[:, :N].set(params["w_fc"])
    b_fc_pad = jnp.zeros((1, n_pad), jnp.float32).at[:, :N].set(params["b_fc"])

    grid = (B // tb,)

    flops = 2 * B * S * Hin * H + 2 * B * S * K * H * C + 2 * B * C * n_pad
    transcendentals = B * S * H
    bytes_accessed = 4 * (emb.size + mask.size
                          + params["w_enc"].size + params["b_enc"].size
                          + params["w_conv"].size + params["b_conv"].size
                          + w_fc_pad.size + b_fc_pad.size + B * n_pad)

    out = pl.pallas_call(
        fused_kernel,
        out_shape=jax.ShapeDtypeStruct((B, 1, n_pad), jnp.float32),
        grid_spec=pltpu.PrefetchScalarGridSpec(
            num_scalar_prefetch=0,
            grid=grid,
            in_specs=[
                pl.BlockSpec((tb, S, Hin), lambda i: (i, 0, 0)),      # emb
                pl.BlockSpec((tb, S, 1), lambda i: (i, 0, 0)),        # mask
                pl.BlockSpec((Hin, H), lambda i: (0, 0)),             # w_enc
                pl.BlockSpec((1, H), lambda i: (0, 0)),               # b_enc
                pl.BlockSpec((K, H, C), lambda i: (0, 0, 0)),         # w_conv
                pl.BlockSpec((1, C), lambda i: (0, 0)),               # b_conv
                pl.BlockSpec((C, n_pad), lambda i: (0, 0)),           # w_fc (padded)
                pl.BlockSpec((1, n_pad), lambda i: (0, 0)),           # b_fc (padded)
            ],
            out_specs=pl.BlockSpec((tb, 1, n_pad), lambda i: (i, 0, 0)),
            scratch_shapes=[pltpu.VMEM((tb, S + 2 * pad, H), jnp.float32)],
        ),
        compiler_params=pltpu.CompilerParams(
            dimension_semantics=("parallel",)),
        cost_estimate=pl.CostEstimate(
            flops=flops, transcendentals=transcendentals,
            bytes_accessed=bytes_accessed),
    )(emb, mask, params["w_enc"], params["b_enc"],
      params["w_conv"], params["b_conv"], w_fc_pad, b_fc_pad)

    return out[:, 0, :N]


# --------------------------------------------------------------------------
# Pure-JAX reference (same math) for a correctness check.
# --------------------------------------------------------------------------
def reference_forward(input_ids, attention_mask, params):
    emb = jnp.take(params["tok_emb"], input_ids, axis=0) + params["pos_emb"][None, :, :]
    mask = attention_mask.astype(jnp.float32)[:, :, None]
    h = jnp.tanh(jnp.einsum("bsh,hd->bsd", emb, params["w_enc"]) + params["b_enc"]) * mask
    K = params["w_conv"].shape[0]
    pad = (K - 1) // 2
    hp = jnp.pad(h, ((0, 0), (pad, pad), (0, 0)))
    S = h.shape[1]
    acc = sum(jnp.einsum("bsh,hc->bsc", hp[:, k:k + S, :], params["w_conv"][k])
              for k in range(K))
    y = jnp.maximum(acc + params["b_conv"], 0.0)
    pooled = jnp.max(y, axis=1)
    return pooled @ params["w_fc"] + params["b_fc"]


if __name__ == "__main__":
    # Small shapes consistent with the forward pass.
    B, S = 2, 8            # batch, sequence length
    VOCAB = 64
    Hin, H = 32, 32        # embedding dim, encoder hidden dim
    K, C = 3, 16           # conv kernel size, cnn out_channels
    N = 4                  # num_classes

    key = jax.random.PRNGKey(0)
    ks = jax.random.split(key, 10)
    params = {
        "tok_emb": 0.02 * jax.random.normal(ks[0], (VOCAB, Hin), jnp.float32),
        "pos_emb": 0.02 * jax.random.normal(ks[1], (S, Hin), jnp.float32),
        "w_enc":   0.1 * jax.random.normal(ks[2], (Hin, H), jnp.float32),
        "b_enc":   0.1 * jax.random.normal(ks[3], (1, H), jnp.float32),
        "w_conv":  0.1 * jax.random.normal(ks[4], (K, H, C), jnp.float32),
        "b_conv":  0.1 * jax.random.normal(ks[5], (1, C), jnp.float32),
        "w_fc":    0.1 * jax.random.normal(ks[6], (C, N), jnp.float32),
        "b_fc":    0.1 * jax.random.normal(ks[7], (1, N), jnp.float32),
    }

    input_ids = jax.random.randint(ks[8], (B, S), 0, VOCAB, jnp.int32)
    attention_mask = jnp.concatenate(
        [jnp.ones((B, S - 2), jnp.int32), jnp.zeros((B, 2), jnp.int32)], axis=1)

    out = combined_model_forward(input_ids, attention_mask, params, tb=1)
    out = jax.block_until_ready(out)

    ref = reference_forward(input_ids, attention_mask, params)
    assert out.shape == (B, N)
    assert jnp.allclose(out, ref, atol=1e-3, rtol=1e-3), "mismatch vs reference"

    print("KERNEL_OK")
</pallas_src>

<mosaic_0001>
module attributes {stable_mosaic.version = 11 : i64} {
  func.func @fused_kernel(%arg0: i32, %arg1: memref<1x8x32xf32, #tpu.memory_space<vmem>>, %arg2: memref<1x8x1xf32, #tpu.memory_space<vmem>>, %arg3: memref<32x32xf32, #tpu.memory_space<vmem>>, %arg4: memref<1x32xf32, #tpu.memory_space<vmem>>, %arg5: memref<3x32x16xf32, #tpu.memory_space<vmem>>, %arg6: memref<1x16xf32, #tpu.memory_space<vmem>>, %arg7: memref<16x128xf32, #tpu.memory_space<vmem>>, %arg8: memref<1x128xf32, #tpu.memory_space<vmem>>, %arg9: memref<1x1x128xf32, #tpu.memory_space<vmem>>, %arg10: memref<1x10x32xf32, #tpu.memory_space<vmem>>) attributes {dimension_semantics = [#tpu.dimension_semantics<parallel>], iteration_bounds = array<i64: 2>, scalar_prefetch = 0 : i64, scratch_operands = 1 : i64, tpu.core_type = #tpu.core_type<tc>, window_params = [{transform_indices = @transform_0, window_bounds = array<i64: 1, 8, 32>}, {transform_indices = @transform_1, window_bounds = array<i64: 1, 8, 1>}, {pipeline_mode = #tpu.pipeline_mode<synchronous>, transform_indices = @transform_2, window_bounds = array<i64: 32, 32>}, {pipeline_mode = #tpu.pipeline_mode<synchronous>, transform_indices = @transform_3, window_bounds = array<i64: 1, 32>}, {pipeline_mode = #tpu.pipeline_mode<synchronous>, transform_indices = @transform_4, window_bounds = array<i64: 3, 32, 16>}, {pipeline_mode = #tpu.pipeline_mode<synchronous>, transform_indices = @transform_5, window_bounds = array<i64: 1, 16>}, {pipeline_mode = #tpu.pipeline_mode<synchronous>, transform_indices = @transform_6, window_bounds = array<i64: 16, 128>}, {pipeline_mode = #tpu.pipeline_mode<synchronous>, transform_indices = @transform_7, window_bounds = array<i64: 1, 128>}, {transform_indices = @transform_8, window_bounds = array<i64: 1, 1, 128>}]} {
    %c0 = arith.constant 0 : index
    %c0_0 = arith.constant 0 : index
    %c0_1 = arith.constant 0 : index
    %0 = vector.load %arg1[%c0, %c0_0, %c0_1] : memref<1x8x32xf32, #tpu.memory_space<vmem>>, vector<1x8x32xf32>
    %1 = vector.shape_cast %0 : vector<1x8x32xf32> to vector<8x32xf32>
    %c0_2 = arith.constant 0 : index
    %c0_3 = arith.constant 0 : index
    %2 = vector.load %arg3[%c0_2, %c0_3] : memref<32x32xf32, #tpu.memory_space<vmem>>, vector<32x32xf32>
    %cst = arith.constant dense<0.000000e+00> : vector<8x32xf32>
    %3 = tpu.matmul %1, %2, %cst {dimension_numbers = #tpu.dot_dimension_numbers<[1], [0], [0], [1], [0, 0, 1, 1], [], []>} : vector<8x32xf32>, vector<32x32xf32>, vector<8x32xf32> -> vector<8x32xf32>
    %c0_4 = arith.constant 0 : index
    %c0_5 = arith.constant 0 : index
    %4 = vector.load %arg4[%c0_4, %c0_5] : memref<1x32xf32, #tpu.memory_space<vmem>>, vector<1x32xf32>
    %5 = vector.broadcast %4 : vector<1x32xf32> to vector<8x32xf32>
    %6 = arith.addf %3, %5 : vector<8x32xf32>
    %7 = math.tanh %6 : vector<8x32xf32>
    %c0_6 = arith.constant 0 : index
    %c0_7 = arith.constant 0 : index
    %c0_8 = arith.constant 0 : index
    %8 = vector.load %arg2[%c0_6, %c0_7, %c0_8] : memref<1x8x1xf32, #tpu.memory_space<vmem>>, vector<1x8x1xf32>
    %9 = vector.shape_cast %8 : vector<1x8x1xf32> to vector<8x1xf32>
    %10 = vector.broadcast %9 : vector<8x1xf32> to vector<8x32xf32>
    %11 = arith.mulf %7, %10 : vector<8x32xf32>
    %cst_9 = arith.constant 0.000000e+00 : f32
    %12 = vector.broadcast %cst_9 : f32 to vector<1x1x32xf32>
    %c0_10 = arith.constant 0 : index
    %c0_11 = arith.constant 0 : index
    %c0_12 = arith.constant 0 : index
    %13 = vector.load %arg10[%c0_10, %c0_11, %c0_12] : memref<1x10x32xf32, #tpu.memory_space<vmem>>, vector<1x1x32xf32>
    tpu.vector_store %arg10[%c0_10, %c0_11, %c0_12], %12 {strides = array<i32>} : memref<1x10x32xf32, #tpu.memory_space<vmem>>, vector<1x1x32xf32>,
    %c0_13 = arith.constant 0 : index
    %c9 = arith.constant 9 : index
    %c0_14 = arith.constant 0 : index
    %14 = vector.load %arg10[%c0_13, %c9, %c0_14] : memref<1x10x32xf32, #tpu.memory_space<vmem>>, vector<1x1x32xf32>
    tpu.vector_store %arg10[%c0_13, %c9, %c0_14], %12 {strides = array<i32>} : memref<1x10x32xf32, #tpu.memory_space<vmem>>, vector<1x1x32xf32>,
    %15 = vector.shape_cast %11 : vector<8x32xf32> to vector<1x8x32xf32>
    %c0_15 = arith.constant 0 : index
    %c1 = arith.constant 1 : index
    %c0_16 = arith.constant 0 : index
    %16 = vector.load %arg10[%c0_15, %c1, %c0_16] : memref<1x10x32xf32, #tpu.memory_space<vmem>>, vector<1x8x32xf32>
    tpu.vector_store %arg10[%c0_15, %c1, %c0_16], %15 {strides = array<i32>} : memref<1x10x32xf32, #tpu.memory_space<vmem>>, vector<1x8x32xf32>,
    %c1_17 = arith.constant 1 : index
    %c0_18 = arith.constant 0 : index
    %c0_19 = arith.constant 0 : index
    %17 = vector.load %arg5[%c1_17, %c0_18, %c0_19] : memref<3x32x16xf32, #tpu.memory_space<vmem>>, vector<1x32x16xf32>
    %18 = vector.shape_cast %17 : vector<1x32x16xf32> to vector<32x16xf32>
    %cst_20 = arith.constant dense<0.000000e+00> : vector<8x16xf32>
    %19 = tpu.matmul %11, %18, %cst_20 {dimension_numbers = #tpu.dot_dimension_numbers<[1], [0], [0], [1], [0, 0, 1, 1], [], []>} : vector<8x32xf32>, vector<32x16xf32>, vector<8x16xf32> -> vector<8x16xf32>
    %c0_21 = arith.constant 0 : index
    %c0_22 = arith.constant 0 : index
    %c0_23 = arith.constant 0 : index
    %20 = vector.load %arg10[%c0_21, %c0_22, %c0_23] : memref<1x10x32xf32, #tpu.memory_space<vmem>>, vector<1x8x32xf32>
    %21 = vector.shape_cast %20 : vector<1x8x32xf32> to vector<8x32xf32>
    %c0_24 = arith.constant 0 : index
    %c0_25 = arith.constant 0 : index
    %c0_26 = arith.constant 0 : index
    %22 = vector.load %arg5[%c0_24, %c0_25, %c0_26] : memref<3x32x16xf32, #tpu.memory_space<vmem>>, vector<1x32x16xf32>
    %23 = vector.shape_cast %22 : vector<1x32x16xf32> to vector<32x16xf32>
    %cst_27 = arith.constant dense<0.000000e+00> : vector<8x16xf32>
    %24 = tpu.matmul %21, %23, %cst_27 {dimension_numbers = #tpu.dot_dimension_numbers<[1], [0], [0], [1], [0, 0, 1, 1], [], []>} : vector<8x32xf32>, vector<32x16xf32>, vector<8x16xf32> -> vector<8x16xf32>
    %25 = arith.addf %19, %24 : vector<8x16xf32>
    %c0_28 = arith.constant 0 : index
    %c2 = arith.constant 2 : index
    %c0_29 = arith.constant 0 : index
    %26 = vector.load %arg10[%c0_28, %c2, %c0_29] : memref<1x10x32xf32, #tpu.memory_space<vmem>>, vector<1x8x32xf32>
    %27 = vector.shape_cast %26 : vector<1x8x32xf32> to vector<8x32xf32>
    %c2_30 = arith.constant 2 : index
    %c0_31 = arith.constant 0 : index
    %c0_32 = arith.constant 0 : index
    %28 = vector.load %arg5[%c2_30, %c0_31, %c0_32] : memref<3x32x16xf32, #tpu.memory_space<vmem>>, vector<1x32x16xf32>
    %29 = vector.shape_cast %28 : vector<1x32x16xf32> to vector<32x16xf32>
    %cst_33 = arith.constant dense<0.000000e+00> : vector<8x16xf32>
    %30 = tpu.matmul %27, %29, %cst_33 {dimension_numbers = #tpu.dot_dimension_numbers<[1], [0], [0], [1], [0, 0, 1, 1], [], []>} : vector<8x32xf32>, vector<32x16xf32>, vector<8x16xf32> -> vector<8x16xf32>
    %31 = arith.addf %25, %30 : vector<8x16xf32>
    %c0_34 = arith.constant 0 : index
    %c0_35 = arith.constant 0 : index
    %32 = vector.load %arg6[%c0_34, %c0_35] : memref<1x16xf32, #tpu.memory_space<vmem>>, vector<1x16xf32>
    %33 = vector.broadcast %32 : vector<1x16xf32> to vector<8x16xf32>
    %34 = arith.addf %31, %33 : vector<8x16xf32>
    %cst_36 = arith.constant 0.000000e+00 : f32
    %35 = vector.broadcast %cst_36 : f32 to vector<8x16xf32>
    %36 = arith.maximumf %34, %35 : vector<8x16xf32>
    %37 = vector.shape_cast %36 : vector<8x16xf32> to vector<1x8x16xf32>
    %cst_37 = arith.constant dense<0xFF800000> : vector<1x16xf32>
    %38 = vector.multi_reduction <maximumf>, %37, %cst_37 [1] : vector<1x8x16xf32> to vector<1x16xf32>
    %c0_38 = arith.constant 0 : index
    %c0_39 = arith.constant 0 : index
    %39 = vector.load %arg7[%c0_38, %c0_39] : memref<16x128xf32, #tpu.memory_space<vmem>>, vector<16x128xf32>
    %cst_40 = arith.constant dense<0.000000e+00> : vector<1x128xf32>
    %40 = tpu.matmul %38, %39, %cst_40 {dimension_numbers = #tpu.dot_dimension_numbers<[1], [0], [0], [1], [0, 0, 1, 1], [], []>} : vector<1x16xf32>, vector<16x128xf32>, vector<1x128xf32> -> vector<1x128xf32>
    %c0_41 = arith.constant 0 : index
    %c0_42 = arith.constant 0 : index
    %41 = vector.load %arg8[%c0_41, %c0_42] : memref<1x128xf32, #tpu.memory_space<vmem>>, vector<1x128xf32>
    %42 = arith.addf %40, %41 : vector<1x128xf32>
    %43 = vector.shape_cast %42 : vector<1x128xf32> to vector<1x1x128xf32>
    %c0_43 = arith.constant 0 : index
    %c0_44 = arith.constant 0 : index
    %c0_45 = arith.constant 0 : index
    %44 = vector.load %arg9[%c0_43, %c0_44, %c0_45] : memref<1x1x128xf32, #tpu.memory_space<vmem>>, vector<1x1x128xf32>
    tpu.vector_store %arg9[%c0_43, %c0_44, %c0_45], %43 {strides = array<i32>} : memref<1x1x128xf32, #tpu.memory_space<vmem>>, vector<1x1x128xf32>,
    return
  }
  func.func @transform_0(%arg0: i32) -> (i32, i32, i32) {
    %c0_i32 = arith.constant 0 : i32
    %c0_i32_0 = arith.constant 0 : i32
    %c0_i32_1 = arith.constant 0 : i32
    return %arg0, %c0_i32, %c0_i32_0 : i32, i32, i32
  }
  func.func @transform_1(%arg0: i32) -> (i32, i32, i32) {
    %c0_i32 = arith.constant 0 : i32
    %c0_i32_0 = arith.constant 0 : i32
    %c0_i32_1 = arith.constant 0 : i32
    return %arg0, %c0_i32, %c0_i32_0 : i32, i32, i32
  }
  func.func @transform_2(%arg0: i32) -> (i32, i32) {
    %c0_i32 = arith.constant 0 : i32
    %c0_i32_0 = arith.constant 0 : i32
    %c0_i32_1 = arith.constant 0 : i32
    return %c0_i32, %c0_i32_0 : i32, i32
  }
  func.func @transform_3(%arg0: i32) -> (i32, i32) {
    %c0_i32 = arith.constant 0 : i32
    %c0_i32_0 = arith.constant 0 : i32
    %c0_i32_1 = arith.constant 0 : i32
    return %c0_i32, %c0_i32_0 : i32, i32
  }
  func.func @transform_4(%arg0: i32) -> (i32, i32, i32) {
    %c0_i32 = arith.constant 0 : i32
    %c0_i32_0 = arith.constant 0 : i32
    %c0_i32_1 = arith.constant 0 : i32
    %c0_i32_2 = arith.constant 0 : i32
    return %c0_i32, %c0_i32_0, %c0_i32_1 : i32, i32, i32
  }
  func.func @transform_5(%arg0: i32) -> (i32, i32) {
    %c0_i32 = arith.constant 0 : i32
    %c0_i32_0 = arith.constant 0 : i32
    %c0_i32_1 = arith.constant 0 : i32
    return %c0_i32, %c0_i32_0 : i32, i32
  }
  func.func @transform_6(%arg0: i32) -> (i32, i32) {
    %c0_i32 = arith.constant 0 : i32
    %c0_i32_0 = arith.constant 0 : i32
    %c0_i32_1 = arith.constant 0 : i32
    return %c0_i32, %c0_i32_0 : i32, i32
  }
  func.func @transform_7(%arg0: i32) -> (i32, i32) {
    %c0_i32 = arith.constant 0 : i32
    %c0_i32_0 = arith.constant 0 : i32
    %c0_i32_1 = arith.constant 0 : i32
    return %c0_i32, %c0_i32_0 : i32, i32
  }
  func.func @transform_8(%arg0: i32) -> (i32, i32, i32) {
    %c0_i32 = arith.constant 0 : i32
    %c0_i32_0 = arith.constant 0 : i32
    %c0_i32_1 = arith.constant 0 : i32
    return %arg0, %c0_i32, %c0_i32_0 : i32, i32, i32
  }
}

</mosaic_0001>

<bundles_post_ra>
// kernel: tpu_custom_call.1
= control target key start
LH: loop header
LB: loop body
LE: loop exit
PB: predicated region body
PF: predicated region fallthrough
CT: control target
= control target key end

     0   :  { %13 = vsyncpa [#allocation4], 0  ;;  %s1273_s0 = inlined_call_operand.vmem [shape: f32[2,8,32], index: 0, kind: input, shape index: {}]   ;;  %s1274_s1 = inlined_call_operand.vmem [shape: f32[2,8,1], index: 1, kind: input, shape index: {}]   ;;  %s1275_s2 = inlined_call_operand.vmem [shape: f32[32,32], index: 2, kind: input, shape index: {}]   ;;  %s1276_s3 = inlined_call_operand.vmem [shape: f32[1,32], index: 3, kind: input, shape index: {}]   ;;  %s1277_s4 = inlined_call_operand.vmem [shape: f32[3,32,16], index: 4, kind: input, shape index: {}]   ;;  %s1278_s5 = inlined_call_operand.vmem [shape: f32[1,16], index: 5, kind: input, shape index: {}]   ;;  %s1279_s6 = inlined_call_operand.vmem [shape: f32[16,128], index: 6, kind: input, shape index: {}]   ;;  %s1280_s7 = inlined_call_operand.vmem [shape: f32[1,128], index: 7, kind: input, shape index: {}]   ;;  %s1281_s8 = inlined_call_operand.hbm [shape: f32[2,1,128], index: 8, kind: output, shape index: {}]  }
   0x1   :  { %15 = vsyncpa [#allocation4 + $0x1], 0  ;;  %s1079_s27 = smov 0   ;;  %s1081_s28 = smov 0  }
   0x2   :  { %s1083_s29 = smov 0   ;;  %s1085_s30 = smov 0  }
   0x3 LB: > { %s1100_s9 = sadd.s32 4294967295, %s1028_s30   ;;  %s825_s10 = sadd.s32 4294967294, %s1028_s30   ;;  %s1028_s30 = sphi %s1085_s30, %s1287_s30   ;;  %s1024_s29 = sphi %s1083_s29, %s1286_s29   ;;  %s1020_s28 = sphi %s1081_s28, %s1285_s28   ;;  %s1016_s27 = sphi %s1079_s27, %s1284_s27  }
   0x4   : > { %s1104_s11 = sadd.s32 1, %s1028_s30   ;;  %s206_s12 = sadd.s32 1, %s1024_s29 }
   0x5   : > { %s203_s13 = ssub.s32 %s1028_s30, %s1104_s11  ;;  %p216_p0 = scmp.ne.s32.totalorder %s1024_s29, %s1020_s28 }
   0x6   : > { %p204_p1 = scmp.eq.s32.totalorder %s203_s13, 0  ;;  %p217_p2 = scmp.eq.s32.totalorder %s1100_s9, 1 }
   0x7   : > { %p222_p3 = scmp.ne.s32.totalorder %s1020_s28, %s1016_s27  ;;  %p223_p4 = scmp.eq.s32.totalorder %s825_s10, 1 }
   0x8   : > { %s1115_s14 = scalar_select %p204_p1, %s1024_s29, %s206_s12  }
   0x9   : > { %p1117_p5 = por %p217_p2, %p216_p0  ;;  %p1121_p6 = por %p223_p4, %p222_p3 }
   0xa   : > { %p828_p7 = scmp.ge.s32.totalorder %s1028_s30, 1  ;;  %p273_p8 = scmp.lt.s32.totalorder %s1028_s30, 3 }
   0xc   : > { %p274_p9 = pnand %p828_p7, %p273_p8 }
   0xd   : > { %p309_p10 = scmp.lt.s32.totalorder (!%p274_p9), %s1100_s9, 1  ;;  %s307_s26 = sand.u32 (!%p274_p9), 1, %s1020_s28  }
   0xe   : > { %277 = sbr.rel (%p274_p9) target bundleno = 675 (0x2a3), region = 52  ;;  %s308_s17 = scalar_lea.vmem (!%p274_p9), [#allocation3], %s307_s26 }
   0xf   : > { %s758_s18 = sshll.u32 (!%p274_p9), %s308_s17, 4  ;;  %s746_s22 = scalar_lea.sflag (!%p274_p9), [#allocation4], %s307_s26  ;;  %s759_s18 = int_to_ptr.vmem [resolvable:$true] %s758_s18 }
  0x10   : > { %s968_s23 = scalar_lea.vmem (!%p274_p9), %s759_s18, 16 }
  0x11   : > { %p969_p11 = scmp.ne.s32.totalorder (!%p274_p9), %s759_s18, %s968_s23 }
  0x13   : > { %v321_v0 = vld [vmem:[%s1275_s2 + $0x18] sm:$0xff]  ;;  %v1030_v1 = vmov 0.0   ;;  %v320_v2 = vld [vmem:[%s1275_s2 + $0x10] sm:$0xff]  ;;  %vm1031_vm0 = vmmov 0   ;;  %s310_s21 = scalar_select %p309_p10, %s1100_s9, 1  ;;  %v1032_v3 = vmov 0  }
  0x14   : > { %872 = vmatprep.subr.mxu0 %v1030_v1  ;;  %880 = vmatprep.mubr.msk.f32.mxu0 %vm1031_vm0, %v1030_v1  ;;  %v319_v4 = vld [vmem:[%s1275_s2 + $0x8] sm:$0xff]  ;;  %v318_v5 = vld [vmem:[%s1275_s2] sm:$0xff]  ;;  %vm329_vm1 = vcmask 261120   ;;  %v836_v8 = vld [vmem:[%s1277_s4 + $0x38] sm:$0xff]  ;;  %vm411_vm2 = vcmask 253952   ;;  %vm660_vm3 = vcmask 130048   ;;  %p970_p12 = pnand %p969_p11, %p1117_p5 }
  0x15   : > { %873 = vmatpush3.msra.mxu0 %v321_v0  ;;  %965 = vset.pattern.permute.xlu0 %v1032_v3  ;;  %s829_s24 = sshll.u32 %s310_s21, 3  ;;  %v835_v9 = vld [vmem:[%s1277_s4 + $0x30] sm:$0xff]  ;;  %v834_v10 = vld [vmem:[%s1277_s4 + $0x28] sm:$0xff]  ;;  %v833_v11 = vld [vmem:[%s1277_s4 + $0x20] sm:$0xff]  ;;  %412 = vst.msk [vmem:[#allocation2] sm:$0x1] %vm411_vm2, %v1030_v1 }
  0x16   : > { %874 = vmatprep.subr.mxu0 %v1030_v1  ;;  %883 = vmatprep.subr.mxu1 %v1030_v1  ;;  %s312_s13 = scalar_lea.vmem %s1273_s0, %s829_s24  ;;  %s316_s19 = scalar_lea.vmem %s1274_s1, %s829_s24  ;;  %v424_v12 = vld [vmem:[%s1277_s4 + $0x18] sm:$0xff]  ;;  %v423_v13 = vld [vmem:[%s1277_s4 + $0x10] sm:$0xff]  ;;  %413 = vst.msk [vmem:[#allocation2 + $0x9] sm:$0x1] %vm411_vm2, %v1030_v1  ;;  %v422_v14 = vld [vmem:[%s1277_s4 + $0x8] sm:$0xff] }
  0x17   : > { %875 = vmatpush3.msra.mxu0 %v320_v2  ;;  %891 = vmatprep.mubr.msk.f32.mxu1 %vm1031_vm0, %v1030_v1  ;;  %v317_v6 = vld [vmem:[%s312_s13] sm:$0xff]  ;;  %v842_v23 = vld [vmem:[%s1277_s4 + $0x58] sm:$0xff]  ;;  %v841_v25 = vld [vmem:[%s1277_s4 + $0x50] sm:$0xff]  ;;  %s846_s13 = sshll.u32 %s1100_s9, 4  ;;  %p971_p13 = pneg %p970_p12 }
  0x18   : > { %876 = vmatprep.subr.mxu0 %v1030_v1  ;;  %v404_v7 = vld [vmem:[%s316_s19] sm:$0xff]  ;;  %884 = vmatpush3.msra.mxu1 %v424_v12  ;;  %v840_v26 = vld [vmem:[%s1277_s4 + $0x48] sm:$0xff]  ;;  %s1238_s21 = scalar_lea.hbm %s1281_s8, %s846_s13  ;;  %s1033_s24 = smov [#allocation3]  }
  0x19   : > { %877 = vmatpush3.msra.mxu0 %v319_v4  ;;  %407 = vperm.xlu0 %965, %v404_v7   ;;  %v421_v15 = vld [vmem:[%s1277_s4] sm:$0xff]  ;;  %v669_v29 = vld [vmem:[%s1279_s6 + $0x8] sm:$0xff]  ;;  %s972_s9 = sshll.u32 %s1033_s24, 4  ;;  %s973_s9 = int_to_ptr.vmem [resolvable:$false] %s972_s9 }
  0x1a   : > { %878 = vmatprep.subr.mxu0 %v1030_v1  ;;  %885 = vmatprep.subr.mxu1 %v1030_v1  ;;  %v831_v16 = vld [vmem:[%s1276_s3] ss:$0 sm:$0xff]  ;;  %s974_s25 = scalar_lea.vmem %s973_s9, 32  ;;  %p975_p0 = scmp.lt.s32.totalorder %s759_s18, %s973_s9 }
  0x1b   : > { %879 = vmatpush3.msra.mxu0 %v318_v5  ;;  %886 = vmatpush3.msra.mxu1 %v423_v13  ;;  %v839_v27 = vld [vmem:[%s1277_s4 + $0x40] sm:$0xff]  ;;  %p976_p1 = scmp.lt.s32.totalorder %s974_s25, %s968_s23 }
  0x1c   : > { %881 = vmatmul.mubr.msk.f32.vlgmr.msra.gmra.mxu0 %vm329_vm1, %v317_v6  ;;  %894 = vmatprep.subr.mxu0 %v1030_v1  ;;  %v668_v30 = vld [vmem:[%s1279_s6] sm:$0xff] }
  0x1d   : > { %902 = vmatprep.mubr.msk.f32.mxu0 %vm1031_vm0, %v1030_v1  ;;  %895 = vmatpush3.msra.mxu0 %v836_v8  ;;  %v844_v37 = vld [vmem:[%s1278_s5] ss:$0 sm:$0xff]  ;;  %p977_p2 = por %p976_p1, %p975_p0 }
  0x1e   : > { %896 = vmatprep.subr.mxu0 %v1030_v1  ;;  %887 = vmatprep.subr.mxu1 %v1030_v1  ;;  %v670_v49 = vld [vmem:[%s1280_s7] sm:$0x1] }
  0x1f   : > { %897 = vmatpush3.msra.mxu0 %v835_v9  ;;  %888 = vmatpush3.msra.mxu1 %v422_v14  ;;  %p978_p3 = pnand %p977_p2, %p971_p13 }
  0x20   : > { %898 = vmatprep.subr.mxu0 %v1030_v1  ;;  %889 = vmatprep.subr.mxu1 %v1030_v1 }
  0x21   : > { %899 = vmatpush3.msra.mxu0 %v834_v10  ;;  %890 = vmatpush3.msra.mxu1 %v421_v15 }
  0x22   : > { %900 = vmatprep.subr.mxu0 %v1030_v1  ;;  %905 = vmatprep.subr.mxu1 %v1030_v1 }
  0x23   : > { %901 = vmatpush3.msra.mxu0 %v833_v11 }
  0x24   : > { %916 = vmatprep.subr.mxu0 %v1030_v1 }
  0x94   : > { %v408_v20 = vpop.permute.xlu0 %407 }
  0xdc   : > { %v399_v17 = vpop.f32.mrf.mxu0 }
  0xdd   : > { %v400_v18 = vadd.f32 %v831_v16, %v399_v17 }
  0xde   : > { %v882_v19 = vpop.f32.mrf.mxu0 }
  0xdf   : > { %966 = vtanh.f32 %v400_v18 }
  0xec   : > { %v967_v21 = vpop.eup %966 }
  0xed   : > { %v410_v22 = vmul.f32 %v967_v21, %v408_v20 }
  0xef   : > { %414 = vst.msk [vmem:[#allocation2 + $0x1] sm:$0xff] %vm329_vm1, %v410_v22  ;;  %903 = vmatmul.mubr.msk.f32.vlgmr.msra.gmra.mxu0 %vm329_vm1, %v410_v22 }
  0xf0   : > { %920 = vmatprep.mubr.msk.f32.mxu0 %vm1031_vm0, %v1030_v1  ;;  %917 = vmatpush3.msra.mxu0 %v669_v29 }
  0xf1   : > { %918 = vmatprep.subr.mxu0 %v1030_v1 }
  0xf2   : > { %919 = vmatpush3.msra.mxu0 %v668_v30 }
  0xf6   : > { %v420_v24 = vld [vmem:[#allocation2] sm:$0xff] }
  0xf7   : > { %892 = vmatmul.mubr.msk.f32.vlgmr.msra.gmra.mxu1 %vm329_vm1, %v420_v24  ;;  %v571_v28 = vld [vmem:[#allocation2 + $0x2] sm:$0xff] }
  0xf8   : > { %906 = vmatpush3.msra.mxu1 %v842_v23  ;;  %913 = vmatprep.mubr.msk.f32.mxu1 %vm1031_vm0, %v1030_v1 }
  0xf9   : > { %907 = vmatprep.subr.mxu1 %v1030_v1 }
  0xfa   : > { %908 = vmatpush3.msra.mxu1 %v841_v25 }
  0xfb   : > { %909 = vmatprep.subr.mxu1 %v1030_v1 }
  0xfc   : > { %910 = vmatpush3.msra.mxu1 %v840_v26 }
  0xfd   : > { %911 = vmatprep.subr.mxu1 %v1030_v1 }
  0xfe   : > { %912 = vmatpush3.msra.mxu1 %v839_v27 }
  0xff   : > { %914 = vmatmul.mubr.msk.f32.vlgmr.msra.gmra.mxu1 %vm329_vm1, %v571_v28 }
 0x1af   : > { %v567_v31 = vpop.f32.mrf.mxu0 }
 0x1b1   : > { %v904_v32 = vpop.f32.mrf.mxu0 }
 0x1b7   : > { %v494_v33 = vpop.f32.mrf.mxu1 }
 0x1b8   : > { %v568_v35 = vadd.f32 %v567_v31, %v494_v33 }
 0x1b9   : > { %v893_v34 = vpop.f32.mrf.mxu1 }
 0x1bf   : > { %v646_v36 = vpop.f32.mrf.mxu1 }
 0x1c0   : > { %v650_v38 = vadd.f32 %v646_v36, %v568_v35 }
 0x1c1   : > { %v915_v39 = vpop.f32.mrf.mxu1 }
 0x1c2   : > { %v658_v40 = vadd.f32 %v844_v37, %v650_v38 }
 0x1c4   : > { %v659_v41 = vmax.f32 %v658_v40, 0.0 }
 0x1c6   : > { %v661_v42 = vsel %vm660_vm3, %v659_v41, -inf }
 0x1c7   : > { %v662_v43 = vrot.slane %v661_v42, 4 }
 0x1c9   : > { %v663_v44 = vmax.f32 %v661_v42, %v662_v43 }
 0x1cb   : > { %v664_v45 = vrot.slane %v663_v44, 2 }
 0x1cd   : > { %v665_v46 = vmax.f32 %v663_v44, %v664_v45 }
 0x1cf   : > { %v666_v47 = vrot.slane %v665_v46, 1 }
 0x1d1   : > { %v667_v48 = vmax.f32 %v665_v46, %v666_v47 }
 0x1d3   : > { %921 = vmatmul.mubr.msk.f32.vlgmr.msra.gmra.mxu0 %vm660_vm3, %v667_v48 }
 0x293   : > { %v740_v50 = vpop.f32.mrf.mxu0 }
 0x294   : > { %v741_v51 = vadd.f32 %v740_v50, %v670_v49 }
 0x295   : > { %v922_v52 = vpop.f32.mrf.mxu0 }
 0x296   : > { %744 = vst [vmem:[%s308_s17] sm:$0x1] %v741_v51 }
 0x297   : > { %981 = shalt.err (!%p978_p3)
}
 0x298   : > { %s982_s10 = scalar_lea.hbm %s1238_s21, 16  ;;  %s986_s13 = scalar_lea.hbm %s1281_s8, 32 }
 0x299   : > { %p983_p4 = scmp.ne.s32.totalorder %s1238_s21, %s982_s10  ;;  %p987_p9 = scmp.lt.s32.totalorder %s1238_s21, %s1281_s8 }
 0x29a   : > { %p988_p10 = scmp.lt.s32.totalorder %s986_s13, %s982_s10 }
 0x29b   : > { %p984_p7 = pnand %p983_p4, %p1117_p5 }
 0x29c   : > { %p989_p11 = por %p988_p10, %p987_p9 }
 0x29d   : > { %p985_p8 = pneg %p984_p7 }
 0x29f   : > { %p990_p12 = pnand %p989_p11, %p985_p8 }
 0x2a1   : > { %993 = shalt.err (!%p990_p12)
}
 0x2a2   : > { %923 = dma.vmem_to_hbm [thread:$0]  (%p1117_p5), %s759_s18, 16, %s1238_s21, %s746_s22  }
 0x2a3 PF: > { %p929_p13 = scmp.ge.s32.totalorder %s1028_s30, 2  ;;  %s770_s20 = sand.u32 1, %s1016_s27  }
 0x2a4   : > { %s771_s23 = scalar_lea.sflag [#allocation4], %s770_s20 }
 0x2a5   : > { %p926_p0 = pnand %p929_p13, %p1121_p6 }
 0x2a7   : > { %p927_p1 = pneg %p926_p0 }
 0x2a9   : > { %1011 = dma.done.wait (%p927_p1), %s771_s23, 16  }
 0x2aa   : > { %1013 = vsyncadd (%p927_p1), %s771_s23, 4294967280  ;;  %p18_p2 = scmp.ge.s32.totalorder %s1104_s11, 4   ;;  %s1284_s27 = smov %s1020_s28 }
 0x2ab   : > { %s1285_s28 = smov %s1024_s29  ;;  %s1286_s29 = smov %s1115_s14 }
 0x2ac   : > { %s1287_s30 = smov %s1104_s11  ;;  %20 = sbr.rel (!%p18_p2) target bundleno = 3 (0x3), region = 92 }
 0x2b1   :  { %775 = vsyncpa [#allocation4], 1 }
 0x2b2   :  { %777 = vsyncpa [#allocation4 + $0x1], 1 }

</bundles_post_ra>
